<compile_context>
chip_gen: v7x
topology: tpu7x:2x2x1
jax: 0.10.0
libtpu: 0.0.40
codegen_flags: <defaults>
</compile_context>

<pallas_src>
import math

import jax
import jax.numpy as jnp
from jax.experimental import pallas as pl
from jax.experimental.pallas import tpu as pltpu


def _drop_path_kernel(x_ref, scale_ref, o_ref):
    # x_ref: (bm, tl)   scale_ref: (bm, 1) f32   o_ref: (bm, tl)
    s = scale_ref[...].astype(x_ref.dtype)      # tiny (bm,1) cast; broadcasts over lanes
    o_ref[...] = x_ref[...] * s                 # native-dtype multiply, no full-tile upcast


def _vmem_limit_bytes():
    try:
        phys = int(pltpu.get_tpu_info().vmem_capacity_bytes)
    except Exception:
        phys = 64 * 1024 * 1024                 # conservative fallback (v7x per-TC VMEM)
    # ~70% of physical, capped; leaves headroom for Mosaic internals / semaphores.
    return min(int(phys * 0.7), 96 * 1024 * 1024)


def _choose_tiles(B, L, itemsize, target_block_bytes):
    """Pick (bm, tl): one lane-dense input block of roughly target_block_bytes."""
    target_elems = max(target_block_bytes // max(itemsize, 1), 8 * 128)

    # Row tile: multiple of 8 sublanes, or the full batch axis if B < 8.
    bm = B if B <= 8 else min((B // 8) * 8, 512)

    # Lane tile: multiple of 128 (unmasked vst on full blocks); a partial last block
    # is masked by Pallas, so this stays legal when L % 128 != 0.
    if L <= 128:
        tl = L                                   # full axis (always legal)
    else:
        lane_cap = (L // 128) * 128              # largest 128-multiple <= L
        tl = min(lane_cap, (max(target_elems // bm, 128) // 128) * 128)
    return bm, tl


def drop_path(x, drop_prob, *, training=False, key=None):
    """Per-sample stochastic depth.  x: (B, ...) -> same shape/dtype."""
    if (not training) or (drop_prob is None) or (drop_prob == 0.0):
        return x                                           # identity, no kernel launch
    if drop_prob >= 1.0:
        return jnp.zeros_like(x)                           # keep_prob == 0: drop every path
    if key is None:
        raise ValueError("drop_path: `key` is required when training with drop_prob > 0")

    keep_prob = 1.0 - float(drop_prob)
    B = x.shape[0]
    L = int(math.prod(x.shape[1:]))

    # Per-sample keep decision (tiny, O(B)): scale_b = mask_b / keep_prob.
    mask = jax.random.bernoulli(key, p=keep_prob, shape=(B,))
    scale = (mask.astype(jnp.float32) / keep_prob).reshape(B, 1)

    x2 = x.reshape(B, L)
    B2, L2 = B, L

    # Small-batch path: fold part of L into the row axis so all 8 sublanes are used.
    if B < 8 and L > 1:
        r0 = 8 // math.gcd(B, 8)                 # smallest r with (B*r) % 8 == 0
        r = 0
        for cand in range(r0, min(L, 64) + 1, r0):
            if L % cand == 0:
                r = cand
                break
        if r > 1:
            x2 = x2.reshape(B * r, L // r)       # row-major: sample b -> rows b*r..b*r+r-1
            scale = jnp.repeat(scale, r, axis=0)
            B2, L2 = B * r, L // r

    vmem_limit = _vmem_limit_bytes()
    bm, tl = _choose_tiles(B2, L2, x2.dtype.itemsize, vmem_limit // 5)
    gi, gj = pl.cdiv(B2, bm), pl.cdiv(L2, tl)

    # Keep >= 2 grid steps on a parallel axis when the problem allows it, so megacore
    # (v7x: 2 TensorCores) can shard a large-but-single-block problem.
    if gi * gj < 2:
        if tl >= 256:
            tl = max(((tl // 2) // 128) * 128, 128)
        elif bm >= 16:
            bm = max(((bm // 2) // 8) * 8, 8)
        gi, gj = pl.cdiv(B2, bm), pl.cdiv(L2, tl)

    out = pl.pallas_call(
        _drop_path_kernel,
        out_shape=jax.ShapeDtypeStruct((B2, L2), x.dtype),
        grid=(gi, gj),                                     # j innermost: scale block index
        in_specs=[                                         # constant along j -> DMA skipped
            pl.BlockSpec((bm, tl), lambda i, j: (i, j)),   # x tile, streamed
            pl.BlockSpec((bm, 1), lambda i, j: (i, 0)),    # per-row scale, reused along j
        ],
        out_specs=pl.BlockSpec((bm, tl), lambda i, j: (i, j)),
        compiler_params=pltpu.CompilerParams(
            dimension_semantics=("parallel", "parallel"),  # no cross-step deps
            vmem_limit_bytes=vmem_limit,
        ),
        cost_estimate=pl.CostEstimate(
            flops=B * L,
            transcendentals=0,
            bytes_accessed=2 * B * L * x2.dtype.itemsize + B2 * 4,
        ),
    )(x2, scale)

    return out.reshape(x.shape)


if __name__ == "__main__":
    # Shapes consistent with DropPath inside a transformer block: batch=2, seq=8, hidden=32.
    B, S, D = 2, 8, 32
    drop_prob = 0.25

    key = jax.random.PRNGKey(0)
    kx, kmask, kx2 = jax.random.split(key, 3)
    x = jax.random.normal(kx, (B, S, D), dtype=jnp.float32)

    out = drop_path(x, drop_prob, training=True, key=kmask)
    out = jax.block_until_ready(out)
    assert out.shape == x.shape and out.dtype == x.dtype

    # Pure-JAX reference of the same math with the same random mask.
    keep_prob = 1.0 - drop_prob
    mask = jax.random.bernoulli(kmask, p=keep_prob, shape=(B,)).astype(jnp.float32)
    ref = x * (mask / keep_prob).reshape(B, 1, 1)
    assert jnp.allclose(out, ref, atol=1e-6, rtol=1e-6)

    # Non-128-multiple feature size with B >= 8 exercises the masked tail-block path.
    B3 = 16
    x3 = jax.random.normal(kx2, (B3, 7, 33), dtype=jnp.float32)
    out3 = jax.block_until_ready(drop_path(x3, drop_prob, training=True, key=kmask))
    mask3 = jax.random.bernoulli(kmask, p=keep_prob, shape=(B3,)).astype(jnp.float32)
    ref3 = x3 * (mask3 / keep_prob).reshape(B3, 1, 1)
    assert jnp.allclose(out3, ref3, atol=1e-6, rtol=1e-6)

    # Eval mode / p == 0 -> identity; p == 1 -> all paths dropped.
    assert jnp.array_equal(drop_path(x, drop_prob, training=False, key=kmask), x)
    assert jnp.array_equal(drop_path(x, 0.0, training=True, key=kmask), x)
    assert jnp.array_equal(drop_path(x, 1.0, training=True, key=kmask), jnp.zeros_like(x))

    print("KERNEL_OK")
</pallas_src>

<mosaic_0001>
module attributes {stable_mosaic.version = 11 : i64} {
  func.func @_drop_path_kernel(%arg0: i32, %arg1: i32, %arg2: memref<8x64xf32, #tpu.memory_space<vmem>>, %arg3: memref<8x1xf32, #tpu.memory_space<vmem>>, %arg4: memref<8x64xf32, #tpu.memory_space<vmem>>) attributes {dimension_semantics = [#tpu.dimension_semantics<parallel>, #tpu.dimension_semantics<parallel>], iteration_bounds = array<i64: 1, 1>, scalar_prefetch = 0 : i64, scratch_operands = 0 : i64, tpu.core_type = #tpu.core_type<tc>, window_params = [{transform_indices = @transform_0, window_bounds = array<i64: 8, 64>}, {transform_indices = @transform_1, window_bounds = array<i64: 8, 1>}, {transform_indices = @transform_2, window_bounds = array<i64: 8, 64>}]} {
    %c0 = arith.constant 0 : index
    %c0_0 = arith.constant 0 : index
    %0 = vector.load %arg3[%c0, %c0_0] : memref<8x1xf32, #tpu.memory_space<vmem>>, vector<8x1xf32>
    %c0_1 = arith.constant 0 : index
    %c0_2 = arith.constant 0 : index
    %1 = vector.load %arg2[%c0_1, %c0_2] : memref<8x64xf32, #tpu.memory_space<vmem>>, vector<8x64xf32>
    %2 = vector.broadcast %0 : vector<8x1xf32> to vector<8x64xf32>
    %3 = arith.mulf %1, %2 : vector<8x64xf32>
    %c0_3 = arith.constant 0 : index
    %c0_4 = arith.constant 0 : index
    %4 = vector.load %arg4[%c0_3, %c0_4] : memref<8x64xf32, #tpu.memory_space<vmem>>, vector<8x64xf32>
    tpu.vector_store %arg4[%c0_3, %c0_4], %3 {strides = array<i32>} : memref<8x64xf32, #tpu.memory_space<vmem>>, vector<8x64xf32>,
    return
  }
  func.func @transform_0(%arg0: i32, %arg1: i32) -> (i32, i32) {
    %c0_i32 = arith.constant 0 : i32
    return %arg0, %arg1 : i32, i32
  }
  func.func @transform_1(%arg0: i32, %arg1: i32) -> (i32, i32) {
    %c0_i32 = arith.constant 0 : i32
    %c0_i32_0 = arith.constant 0 : i32
    return %arg0, %c0_i32 : i32, i32
  }
  func.func @transform_2(%arg0: i32, %arg1: i32) -> (i32, i32) {
    %c0_i32 = arith.constant 0 : i32
    return %arg0, %arg1 : i32, i32
  }
}

</mosaic_0001>

<bundles_post_ra>
// kernel: tpu_custom_call.1
= control target key start
LH: loop header
LB: loop body
LE: loop exit
PB: predicated region body
PF: predicated region fallthrough
CT: control target
= control target key end

     0   :  { %s98_s0 = inlined_call_operand.vmem [shape: f32[8,64], index: 0, kind: input, shape index: {}]   ;;  %s99_s1 = inlined_call_operand.vmem [shape: f32[8,1], index: 1, kind: input, shape index: {}]   ;;  %s100_s2 = inlined_call_operand.hbm [shape: f32[8,64], index: 2, kind: output, shape index: {}]  }
   0x1   :  { %v12_v0 = vld [vmem:[%s99_s1] sm:$0xff] }
   0x2   :  { %7 = vsyncpa [#allocation3], 0  ;;  %v63_v1 = vmov 0   ;;  %v13_v2 = vld [vmem:[%s98_s0] sm:$0xff]  ;;  %s64_s13 = smov [#allocation2]   ;;  %vm20_vm0 = vcmask 523264  }
   0x3   :  { %38 = vset.pattern.permute.xlu0 %v63_v1  ;;  %s28_s14 = sshll.u32 %s64_s13, 4  ;;  %s29_s14 = int_to_ptr.vmem [resolvable:$true] %s28_s14 }
   0x4   :  { %16 = vperm.xlu0 %38, %v12_v0   ;;  %s39_s15 = scalar_lea.vmem %s29_s14, 128  ;;  %p44_p1 = scmp.lt.s32.totalorder %s29_s14, %s29_s14 }
   0x5   :  { %p40_p0 = scmp.ne.s32.totalorder %s29_s14, %s39_s15  ;;  %p45_p2 = scmp.lt.s32.totalorder %s39_s15, %s39_s15 }
   0x7   :  { %p46_p3 = por %p45_p2, %p44_p1 }
   0x9   :  { %p47_p4 = pnand %p46_p3, %p40_p0 }
  0x83   :  { %v17_v3 = vpop.permute.xlu0 %16 }
  0x84   :  { %v19_v4 = vmul.f32 %v17_v3, %v13_v2 }
  0x86   :  { %21 = vst.msk [vmem:[#allocation2] sm:$0xff] %vm20_vm0, %v19_v4 }
  0x87   :  { %50 = shalt.err (!%p47_p4)
}
  0x88   :  { %s51_s17 = scalar_lea.hbm %s100_s2, 128 }
  0x89   :  { %p52_p5 = scmp.ne.s32.totalorder %s100_s2, %s51_s17  ;;  %p55_p6 = scmp.lt.u32.totalorder %s51_s17, %s100_s2 }
  0x8b   :  { %p57_p7 = pnand %p55_p6, %p52_p5 }
  0x8d   :  { %60 = shalt.err (!%p57_p7)
}
  0x8e   :  { %31 = dma.vmem_to_hbm [thread:$0]  %s29_s14, 128, %s100_s2, [#allocation3]  }
  0x8f   :  { %61 = dma.done.wait [#allocation3], 128  }
  0x90   :  { %62 = vsyncadd [#allocation3], 4294967168 }
  0x91   :  { %35 = vsyncpa [#allocation3], 1 }

</bundles_post_ra>
